<compile_context>
chip_gen: v5e
topology: v5e:2x2
jax: 0.10.0
libtpu: 0.0.40
codegen_flags: <defaults>
</compile_context>

<pallas_src>
import jax
import jax.numpy as jnp
from jax.experimental import pallas as pl
from jax.experimental.pallas import tpu as pltpu


def _round_up(v, m):
    return (v + m - 1) // m * m


def _vmem_budget_bytes():
    """~3/4 of per-core physical VMEM (v5e/v6e: ~96 MiB, v7x: ~48 MiB)."""
    cap = None
    try:
        cap = getattr(pltpu.get_tpu_info(), "vmem_capacity_bytes", None)
    except Exception:
        cap = None
    if not cap:
        cap = 64 * 1024 * 1024  # conservative fallback (v7x physical size)
    return (int(cap) * 3) // 4


def _patch_embed_kernel(x_ref, w_ref, b_ref, o_ref):
    # x_ref: (C, TN, P) raw patch block, w_ref: (C, P, TE) (bf16),
    # b_ref: (1, TE) f32, o_ref: (TN, TE).
    # Per-channel MXU matmuls with f32 accumulation -- no in-kernel transposes,
    # the patch "reshape" is expressed as a sum over channels.
    acc = jnp.zeros(o_ref.shape, jnp.float32)
    for c in range(x_ref.shape[0]):           # C is small & static -> unrolled
        acc = acc + jnp.dot(
            x_ref[c].astype(w_ref.dtype),     # f32 -> bf16 cast on the VPU
            w_ref[c],
            preferred_element_type=jnp.float32)
    o_ref[...] = (acc + b_ref[...]).astype(o_ref.dtype)


def patch_embed_1d(x, weight, bias, *, patch_size,
                   compute_dtype=jnp.bfloat16, channels_last=False):
    """1D patch embedding (Conv1d with kernel_size == stride == patch_size).

    x: (B, C, L), weight: (E, C, P), bias: (E,).
    Returns (B, E, N) like the PyTorch module (or (B, N, E) if channels_last).
    """
    B, C, L = x.shape
    E, Cw, P = weight.shape
    assert Cw == C and P == patch_size and L % P == 0, (x.shape, weight.shape)
    N = L // P

    io = jnp.dtype(x.dtype).itemsize          # x / out element bytes
    wb = jnp.dtype(compute_dtype).itemsize    # weight element bytes

    E_pad = _round_up(E, 128)                 # lane-dense weight & output

    # ---------------- tile selection under a per-generation VMEM budget -----
    budget = _vmem_budget_bytes()

    def vmem_bytes(tn, te):
        return (2 * C * tn * P * io           # x block   (double-buffered)
                + 2 * tn * te * io            # out block (double-buffered)
                + 2 * C * P * te * wb         # weight    (double-buffered)
                + 2 * te * 4)                 # bias      (double-buffered)

    tn_min = N if N < 8 else 8

    # Largest E-tile (multiple of 128) whose weight block fits next to a
    # minimal x/out tile. TE == E_pad (weight effectively resident; its block
    # index is constant across (b, n) so it is only fetched once per E-tile)
    # is the common case; tiling E is the large-weight fallback.
    TE = E_pad
    while TE > 128 and vmem_bytes(tn_min, TE) > budget:
        TE = _round_up(TE // 2, 128)
    et = pl.cdiv(E_pad, TE)
    TE = _round_up(pl.cdiv(E_pad, et), 128)   # balanced E tiles
    et = pl.cdiv(E_pad, TE)

    # N-tile: whole N per step when it fits (contiguous DMA, zero overshoot);
    # otherwise a balanced multiple of 8 (Pallas masks the overhanging block).
    rem = budget - (2 * C * P * TE * wb + 2 * TE * 4)
    per_row = 2 * (C * P * io + TE * io)
    tn_cap = max(tn_min, rem // per_row) if rem > 0 else tn_min
    tn_cap = min(tn_cap, 1024)                # keep steps pipeline-friendly
    if N <= tn_cap:
        TN = N
    else:
        tn_cap8 = max(8, (tn_cap // 8) * 8)
        nt = pl.cdiv(N, tn_cap8)
        TN = _round_up(pl.cdiv(N, nt), 8)
    nt = pl.cdiv(N, TN)

    vmem_needed = vmem_bytes(TN, TE)
    vmem_limit = int(min(budget + (8 << 20),
                         max(32 << 20, vmem_needed + (4 << 20))))
    if vmem_limit < vmem_needed:              # never undersize (correctness)
        vmem_limit = int(vmem_needed + (4 << 20))

    # ---------------- operand prep (all cheap / one-time) -------------------
    x4 = x.reshape(B, C, N, P)                                    # free reshape
    w_cpe = jnp.transpose(weight, (1, 2, 0)).astype(compute_dtype)  # (C, P, E)
    if E_pad != E:
        w_cpe = jnp.pad(w_cpe, ((0, 0), (0, 0), (0, E_pad - E)))
    b2 = bias.astype(jnp.float32).reshape(1, E)
    if E_pad != E:
        b2 = jnp.pad(b2, ((0, 0), (0, E_pad - E)))

    grid = (B, nt, et)

    cost = pl.CostEstimate(
        flops=2 * B * N * C * P * E_pad,
        transcendentals=0,
        bytes_accessed=(B * C * L * io + C * P * E_pad * wb + E_pad * 4
                        + B * N * E_pad * io),
    )

    out = pl.pallas_call(
        _patch_embed_kernel,
        out_shape=jax.ShapeDtypeStruct((B, N, E_pad), x.dtype),
        grid=grid,
        in_specs=[
            # raw signal patches, streamed straight from the (B, C, N, P) view
            pl.BlockSpec((None, C, TN, P), lambda b, n, e: (b, 0, n, 0)),
            # weight / bias: block index constant over (b, n) -> fetched once
            pl.BlockSpec((C, P, TE), lambda b, n, e: (0, 0, e)),
            pl.BlockSpec((1, TE), lambda b, n, e: (0, e)),
        ],
        out_specs=pl.BlockSpec((None, TN, TE), lambda b, n, e: (b, n, e)),
        compiler_params=pltpu.CompilerParams(
            dimension_semantics=("parallel", "parallel", "arbitrary"),
            vmem_limit_bytes=vmem_limit,
        ),
        cost_estimate=cost,
    )(x4, w_cpe, b2)

    if E_pad != E:
        out = out[:, :, :E]                   # strip lane padding
    if channels_last:
        return out                            # (B, N, E)
    # TODO(synk): this final (B, N, E) -> (B, E, N) relayout is one extra
    # output-sized HBM round trip done by XLA; pass channels_last=True and
    # drop it if the consumer accepts patches-major layout.
    return jnp.transpose(out, (0, 2, 1))      # (B, E, N), PyTorch Conv1d layout


if __name__ == "__main__":
    # Small shapes consistent with the module (signal_len % patch_size == 0).
    B, C, L = 2, 4, 128
    patch_size = 16
    embed_dim = 32
    N = L // patch_size

    key = jax.random.PRNGKey(0)
    kx, kw, kb = jax.random.split(key, 3)
    x = jax.random.normal(kx, (B, C, L), dtype=jnp.float32)
    weight = jax.random.normal(kw, (embed_dim, C, patch_size), dtype=jnp.float32) * 0.02
    bias = jax.random.normal(kb, (embed_dim,), dtype=jnp.float32) * 0.02

    y = jax.block_until_ready(patch_embed_1d(x, weight, bias, patch_size=patch_size))
    assert y.shape == (B, embed_dim, N), y.shape

    x4 = x.reshape(B, C, N, patch_size)

    # Reference 1 (strict): same bf16-quantized inputs, f32 accumulation --
    # exactly the kernel's arithmetic, validates all plumbing/tiling.
    xq = x4.astype(jnp.bfloat16).astype(jnp.float32)
    wq = weight.astype(jnp.bfloat16).astype(jnp.float32)
    ref_q = jnp.einsum("bcnp,ecp->ben", xq, wq,
                       precision="highest") + bias[None, :, None]
    assert jnp.allclose(y, ref_q, atol=1e-4, rtol=1e-4), \
        float(jnp.max(jnp.abs(y - ref_q)))

    # Reference 2 (module semantics): full-f32 conv math, loose tolerance for
    # the deliberate bf16 MXU inputs.
    ref = jnp.einsum("bcnp,ecp->ben", x4, weight,
                     precision="highest") + bias[None, :, None]
    assert jnp.allclose(y, ref, atol=5e-2, rtol=5e-2), \
        float(jnp.max(jnp.abs(y - ref)))

    print("KERNEL_OK")
</pallas_src>

<mosaic_0001>
module attributes {stable_mosaic.version = 11 : i64} {
  func.func @_patch_embed_kernel(%arg0: i32, %arg1: i32, %arg2: i32, %arg3: memref<1x4x8x16xf32, #tpu.memory_space<vmem>>, %arg4: memref<4x16x128xbf16, #tpu.memory_space<vmem>>, %arg5: memref<1x128xf32, #tpu.memory_space<vmem>>, %arg6: memref<1x8x128xf32, #tpu.memory_space<vmem>>) attributes {dimension_semantics = [#tpu.dimension_semantics<parallel>, #tpu.dimension_semantics<parallel>, #tpu.dimension_semantics<arbitrary>], iteration_bounds = array<i64: 2, 1, 1>, scalar_prefetch = 0 : i64, scratch_operands = 0 : i64, tpu.core_type = #tpu.core_type<tc>, window_params = [{transform_indices = @transform_0, window_bounds = array<i64: 1, 4, 8, 16>}, {transform_indices = @transform_1, window_bounds = array<i64: 4, 16, 128>}, {transform_indices = @transform_2, window_bounds = array<i64: 1, 128>}, {transform_indices = @transform_3, window_bounds = array<i64: 1, 8, 128>}]} {
    %cst = arith.constant 0.000000e+00 : f32
    %0 = vector.broadcast %cst : f32 to vector<8x128xf32>
    %c0 = arith.constant 0 : index
    %c0_0 = arith.constant 0 : index
    %c0_1 = arith.constant 0 : index
    %c0_2 = arith.constant 0 : index
    %1 = vector.load %arg3[%c0, %c0_0, %c0_1, %c0_2] : memref<1x4x8x16xf32, #tpu.memory_space<vmem>>, vector<1x1x8x16xf32>
    %2 = vector.shape_cast %1 : vector<1x1x8x16xf32> to vector<8x16xf32>
    %3 = arith.truncf %2 : vector<8x16xf32> to vector<8x16xbf16>
    %c0_3 = arith.constant 0 : index
    %c0_4 = arith.constant 0 : index
    %c0_5 = arith.constant 0 : index
    %4 = vector.load %arg4[%c0_3, %c0_4, %c0_5] : memref<4x16x128xbf16, #tpu.memory_space<vmem>>, vector<1x16x128xbf16>
    %5 = vector.shape_cast %4 : vector<1x16x128xbf16> to vector<16x128xbf16>
    %cst_6 = arith.constant dense<0.000000e+00> : vector<8x128xf32>
    %6 = tpu.matmul %3, %5, %cst_6 {dimension_numbers = #tpu.dot_dimension_numbers<[1], [0], [0], [1], [0, 0, 1, 1], [], []>} : vector<8x16xbf16>, vector<16x128xbf16>, vector<8x128xf32> -> vector<8x128xf32>
    %7 = arith.addf %0, %6 : vector<8x128xf32>
    %c0_7 = arith.constant 0 : index
    %c1 = arith.constant 1 : index
    %c0_8 = arith.constant 0 : index
    %c0_9 = arith.constant 0 : index
    %8 = vector.load %arg3[%c0_7, %c1, %c0_8, %c0_9] : memref<1x4x8x16xf32, #tpu.memory_space<vmem>>, vector<1x1x8x16xf32>
    %9 = vector.shape_cast %8 : vector<1x1x8x16xf32> to vector<8x16xf32>
    %10 = arith.truncf %9 : vector<8x16xf32> to vector<8x16xbf16>
    %c1_10 = arith.constant 1 : index
    %c0_11 = arith.constant 0 : index
    %c0_12 = arith.constant 0 : index
    %11 = vector.load %arg4[%c1_10, %c0_11, %c0_12] : memref<4x16x128xbf16, #tpu.memory_space<vmem>>, vector<1x16x128xbf16>
    %12 = vector.shape_cast %11 : vector<1x16x128xbf16> to vector<16x128xbf16>
    %cst_13 = arith.constant dense<0.000000e+00> : vector<8x128xf32>
    %13 = tpu.matmul %10, %12, %cst_13 {dimension_numbers = #tpu.dot_dimension_numbers<[1], [0], [0], [1], [0, 0, 1, 1], [], []>} : vector<8x16xbf16>, vector<16x128xbf16>, vector<8x128xf32> -> vector<8x128xf32>
    %14 = arith.addf %7, %13 : vector<8x128xf32>
    %c0_14 = arith.constant 0 : index
    %c2 = arith.constant 2 : index
    %c0_15 = arith.constant 0 : index
    %c0_16 = arith.constant 0 : index
    %15 = vector.load %arg3[%c0_14, %c2, %c0_15, %c0_16] : memref<1x4x8x16xf32, #tpu.memory_space<vmem>>, vector<1x1x8x16xf32>
    %16 = vector.shape_cast %15 : vector<1x1x8x16xf32> to vector<8x16xf32>
    %17 = arith.truncf %16 : vector<8x16xf32> to vector<8x16xbf16>
    %c2_17 = arith.constant 2 : index
    %c0_18 = arith.constant 0 : index
    %c0_19 = arith.constant 0 : index
    %18 = vector.load %arg4[%c2_17, %c0_18, %c0_19] : memref<4x16x128xbf16, #tpu.memory_space<vmem>>, vector<1x16x128xbf16>
    %19 = vector.shape_cast %18 : vector<1x16x128xbf16> to vector<16x128xbf16>
    %cst_20 = arith.constant dense<0.000000e+00> : vector<8x128xf32>
    %20 = tpu.matmul %17, %19, %cst_20 {dimension_numbers = #tpu.dot_dimension_numbers<[1], [0], [0], [1], [0, 0, 1, 1], [], []>} : vector<8x16xbf16>, vector<16x128xbf16>, vector<8x128xf32> -> vector<8x128xf32>
    %21 = arith.addf %14, %20 : vector<8x128xf32>
    %c0_21 = arith.constant 0 : index
    %c3 = arith.constant 3 : index
    %c0_22 = arith.constant 0 : index
    %c0_23 = arith.constant 0 : index
    %22 = vector.load %arg3[%c0_21, %c3, %c0_22, %c0_23] : memref<1x4x8x16xf32, #tpu.memory_space<vmem>>, vector<1x1x8x16xf32>
    %23 = vector.shape_cast %22 : vector<1x1x8x16xf32> to vector<8x16xf32>
    %24 = arith.truncf %23 : vector<8x16xf32> to vector<8x16xbf16>
    %c3_24 = arith.constant 3 : index
    %c0_25 = arith.constant 0 : index
    %c0_26 = arith.constant 0 : index
    %25 = vector.load %arg4[%c3_24, %c0_25, %c0_26] : memref<4x16x128xbf16, #tpu.memory_space<vmem>>, vector<1x16x128xbf16>
    %26 = vector.shape_cast %25 : vector<1x16x128xbf16> to vector<16x128xbf16>
    %cst_27 = arith.constant dense<0.000000e+00> : vector<8x128xf32>
    %27 = tpu.matmul %24, %26, %cst_27 {dimension_numbers = #tpu.dot_dimension_numbers<[1], [0], [0], [1], [0, 0, 1, 1], [], []>} : vector<8x16xbf16>, vector<16x128xbf16>, vector<8x128xf32> -> vector<8x128xf32>
    %28 = arith.addf %21, %27 : vector<8x128xf32>
    %c0_28 = arith.constant 0 : index
    %c0_29 = arith.constant 0 : index
    %29 = vector.load %arg5[%c0_28, %c0_29] : memref<1x128xf32, #tpu.memory_space<vmem>>, vector<1x128xf32>
    %30 = vector.broadcast %29 : vector<1x128xf32> to vector<8x128xf32>
    %31 = arith.addf %28, %30 : vector<8x128xf32>
    %c0_30 = arith.constant 0 : index
    %c0_31 = arith.constant 0 : index
    %c0_32 = arith.constant 0 : index
    %32 = vector.load %arg6[%c0_30, %c0_31, %c0_32] : memref<1x8x128xf32, #tpu.memory_space<vmem>>, vector<1x8x128xf32>
    %33 = vector.shape_cast %32 : vector<1x8x128xf32> to vector<8x128xf32>
    %34 = vector.shape_cast %31 : vector<8x128xf32> to vector<1x8x128xf32>
    tpu.vector_store %arg6[%c0_30, %c0_31, %c0_32], %34 {strides = array<i32>} : memref<1x8x128xf32, #tpu.memory_space<vmem>>, vector<1x8x128xf32>,
    return
  }
  func.func @transform_0(%arg0: i32, %arg1: i32, %arg2: i32) -> (i32, i32, i32, i32) {
    %c0_i32 = arith.constant 0 : i32
    %c0_i32_0 = arith.constant 0 : i32
    %c0_i32_1 = arith.constant 0 : i32
    return %arg0, %c0_i32, %arg1, %c0_i32_0 : i32, i32, i32, i32
  }
  func.func @transform_1(%arg0: i32, %arg1: i32, %arg2: i32) -> (i32, i32, i32) {
    %c0_i32 = arith.constant 0 : i32
    %c0_i32_0 = arith.constant 0 : i32
    %c0_i32_1 = arith.constant 0 : i32
    return %c0_i32, %c0_i32_0, %arg2 : i32, i32, i32
  }
  func.func @transform_2(%arg0: i32, %arg1: i32, %arg2: i32) -> (i32, i32) {
    %c0_i32 = arith.constant 0 : i32
    %c0_i32_0 = arith.constant 0 : i32
    return %c0_i32, %arg2 : i32, i32
  }
  func.func @transform_3(%arg0: i32, %arg1: i32, %arg2: i32) -> (i32, i32, i32) {
    %c0_i32 = arith.constant 0 : i32
    return %arg0, %arg1, %arg2 : i32, i32, i32
  }
}

</mosaic_0001>

<bundles_post_ra>
// kernel: tpu_custom_call.1
= control target key start
LH: loop header
LB: loop body
LE: loop exit
PB: predicated region body
PF: predicated region fallthrough
CT: control target
= control target key end

     0   :  { %s951_s0 = inlined_call_operand.hbm [shape: f32[2,4,8,16], index: 0, kind: input, shape index: {}]   ;;  %s952_s1 = inlined_call_operand.hbm [shape: bf16[4,16,128], index: 1, kind: input, shape index: {}]   ;;  %s953_s2 = inlined_call_operand.vmem [shape: f32[1,128], index: 2, kind: input, shape index: {}]   ;;  %s954_s3 = inlined_call_operand.hbm [shape: f32[2,8,128], index: 3, kind: output, shape index: {}]  }
   0x1   :  { %955 = sst [smem:[#allocation11_spill]] %s952_s1 }
   0x2   :  { %8 = vsyncpa [#allocation3], 0 }
   0x3   :  { %10 = vsyncpa [#allocation3 + $0x1], 0 }
   0x4   :  { %11 = vsyncpa [#allocation6], 0 }
   0x5   :  { %12 = vsyncpa [#allocation4], 0 }
   0x6   :  { %14 = vsyncpa [#allocation4 + $0x1], 0  ;;  %s798_s12 = smov 0   ;;  %s800_s13 = smov 0  }
   0x7   :  { %s802_s14 = smov 0   ;;  %s804_s15 = smov 0  }
   0x8   :  { %s806_s16 = smov 0   ;;  %s808_s17 = smov 0  }
   0x9 LB: > { %s502_s18 = sadd.s32 4294967295, %s771_s17   ;;  %s503_s19 = sadd.s32 4294967294, %s771_s17   ;;  %s771_s17 = sphi %s808_s17, %s20_s17   ;;  %s767_s16 = sphi %s806_s16, %s968_s16   ;;  %s763_s15 = sphi %s804_s15, %s967_s15   ;;  %s759_s14 = sphi %s802_s14, %s966_s14   ;;  %s755_s13 = sphi %s800_s13, %s965_s13   ;;  %s751_s12 = sphi %s798_s12, %s964_s12  }
   0xa   : > { %p61_p0 = scmp.ne.s32.totalorder %s755_s13, %s751_s12  ;;  %p832_p1 = scmp.eq.s32.totalorder %s502_s18, 0 }
   0xb   : > { %p836_p2 = scmp.eq.s32.totalorder %s502_s18, 1  ;;  %p147_p3 = scmp.eq.s32.totalorder %s503_s19, 1 }
   0xc   : > { %p842_p4 = por %p832_p1, %p61_p0  ;;  %p504_p5 = scmp.ge.s32.totalorder %s771_s17, 1 }
   0xd   : > { %p847_p6 = por %p147_p3, %p61_p0  ;;  %p154_p7 = scmp.lt.s32.totalorder %s771_s17, 3 }
   0xe   : > { %s960_s1 = sld [smem:[#allocation11_spill]]  ;;  %s773_s28 = smov [#allocation5]  }
   0xf   : > { %p855_p8 = pnand %p504_p5, %p154_p7  ;;  %s169_s29 = sshll.u32 %s773_s28, 4  ;;  %s170_s29 = int_to_ptr.vmem [resolvable:$true] %s169_s29 }
  0x10   : > { %p507_p11 = scmp.ge.s32.totalorder %s771_s17, 2  ;;  %s774_s30 = smov 64  }
  0x11   : > { %p555_p9 = pneg %p855_p8  ;;  %s775_s4 = smov 4  }
  0x12   : > { %s39_s5 = sadd.s32 1, %s767_s16  ;;  %s48_s6 = sadd.s32 1, %s759_s14 }
  0x13   : > { %p556_p10 = pnand %p555_p9, %p832_p1  ;;  %p41_p12 = scmp.ge.s32.totalorder %s39_s5, 2 }
  0x14   : > { %s167_s26 = sshll.u32 %s960_s1, 4  ;;  %p55_p13 = scmp.ne.s32.totalorder %s759_s14, %s755_s13  ;;  %s168_s26 = int_to_ptr.hbm [resolvable:$true] %s167_s26 }
  0x15   : > { %558 = dma.hbm_to_vmem [thread:$0]  (!%p556_p10), %s168_s26, 512, %s170_s29, [#allocation6], %s774_s30, %s774_s30, %s775_s4  }
  0x16   : > { %p56_p0 = scmp.eq.s32.totalorder %s771_s17, 0  ;;  %s970_s5 = smov (%p41_p12, %s39_s5), 0 }
  0x17   : > { %p877_p5 = por %p836_p2, %p55_p13  ;;  %s43_s9 = ssub.s32 %s767_s16, %s970_s5 }
  0x18   : > { %p871_p3 = por %p56_p0, %p55_p13  ;;  %p568_p7 = scmp.lt.s32.totalorder %s771_s17, 2 }
  0x19   : > { %p46_p9 = scmp.eq.s32.totalorder %s43_s9, 0  ;;  %s189_s10 = sand.u32 1, %s759_s14  }
  0x1a   : > { %s508_s11 = sshll.u32 %s189_s10, 5  ;;  %s542_s19 = sshll.u32 %s767_s16, 5 }
  0x1b   : > { %s886_s18 = scalar_select %p46_p9, %s759_s14, %s48_s6  }
  0x1c   : > { %s199_s26 = scalar_lea.hbm %s951_s0, %s542_s19  ;;  %s193_s28 = scalar_lea.vmem [#allocation2], %s508_s11 }
  0x1d   : > { %s202_s29 = sshll.u32 %s193_s28, 4  ;;  %s200_s21 = sshll.u32 %s199_s26, 4  ;;  %s203_s29 = int_to_ptr.vmem [resolvable:$true] %s202_s29  ;;  %s201_s21 = int_to_ptr.hbm [resolvable:$true] %s200_s21 }
  0x1e   : > { %p560_p2 = pnand %p568_p7, %p871_p3  ;;  %s190_s30 = scalar_lea.sflag [#allocation3], %s189_s10 }
  0x1f   : > { %s776_s4 = smov 128   ;;  %s777_s1 = smov 8  }
  0x20   : > { %562 = dma.hbm_to_vmem [thread:$0]  (!%p560_p2), %s201_s21, 512, %s203_s29, %s190_s30, %s776_s4, %s776_s4, %s777_s1  }
  0x21   : > { %214 = sbr.rel (%p855_p8) target bundleno = 189 (0xbd), region = 32  ;;  %s897_s6 = sand.u32 (!%p855_p8), 1, %s755_s13  }
  0x22   : > { %s512_s9 = sshll.u32 (!%p855_p8), %s897_s6, 5  ;;  %s217_s11 = scalar_lea.sflag (!%p855_p8), [#allocation3], %s897_s6 }
  0x23   : > { %s220_s19 = scalar_lea.vmem (!%p855_p8), [#allocation2], %s512_s9 }
  0x26   : > { %738 = dma.done.wait (%p842_p4), %s217_s11, 512  }
  0x27   : > { %740 = vsyncadd (%p842_p4), %s217_s11, 4294966784 }
  0x28   : > { %742 = dma.done.wait (%p832_p1), [#allocation6], 512  }
  0x29   : > { %744 = vsyncadd (%p832_p1), [#allocation6], 4294966784  ;;  %v544_v0 = vld [vmem:[#allocation5 + $0x8] sm:$0xff]  ;;  %v543_v1 = vld [vmem:[#allocation5] sm:$0xff]  ;;  %vm272_vm0 = vcmask 130048   ;;  %s514_s1 = sshll.u32 %s897_s6, 3 }
  0x2a   : > { %v545_v2 = vld [vmem:[#allocation5 + $0x10] sm:$0xff]  ;;  %v546_v3 = vld [vmem:[#allocation5 + $0x18] sm:$0xff]  ;;  %v515_v4 = vld [vmem:[%s220_s19 + $0x8] sm:$0xff]  ;;  %283 = vmatpush.bf16.msra.mxu0 %v544_v0  ;;  %305 = vmatpush.bf16.msra.mxu1 %v543_v1  ;;  %s539_s20 = sshll.u32 %s763_s15, 3  ;;  %s251_s25 = scalar_lea.vmem [#allocation7], %s514_s1 }
  0x2b   : > { %v256_v5 = vld [vmem:[%s220_s19] sm:$0xff]  ;;  %v262_v6 = vpack.c.bf16 %v515_v4, %v515_v4  ;;  %v526_v8 = vld [vmem:[%s220_s19 + $0x10] sm:$0xff]  ;;  %v532_v9 = vld [vmem:[%s220_s19 + $0x18] sm:$0xff]  ;;  %333 = vmatpush.bf16.msra.mxu2 %v545_v2  ;;  %362 = vmatpush.bf16.msra.mxu3 %v546_v3  ;;  %s388_s7 = scalar_lea.hbm %s954_s3, %s539_s20  ;;  %s390_s26 = sshll.u32 %s251_s25, 4  ;;  %s391_s26 = int_to_ptr.vmem [resolvable:$true] %s390_s26 }
  0x2c   : > { %v257_v7 = vpack.c.bf16 %v256_v5, %v256_v5  ;;  %v313_v10 = vpack.c.bf16 %v526_v8, %v526_v8  ;;  %v342_v11 = vpack.c.bf16 %v532_v9, %v532_v9  ;;  %v624_v18 = vld [vmem:[%s953_s2] ss:$0 sm:$0xff]  ;;  %s392_s28 = sshll.u32 %s388_s7, 4  ;;  %s376_s15 = scalar_lea.sflag [#allocation4], %s897_s6  ;;  %s393_s28 = int_to_ptr.hbm [resolvable:$true] %s392_s28 }
  0x2d   : > { %520 = vmatmul.msk.bf16.vlgmr.msra.gmra.mxu0 %vm272_vm0, %v262_v6  ;;  %s699_s29 = sshra.s32 %s393_s28, 4  ;;  %s705_s9 = scalar_lea.hbm %s954_s3, 16  ;;  %s700_s29 = int_to_ptr.hbm [resolvable:$true] %s699_s29 }
  0x2e   : > { %525 = vmatmul.msk.bf16.vlgmr.msra.gmra.mxu1 %vm272_vm0, %v257_v7  ;;  %531 = vmatmul.msk.bf16.vlgmr.msra.gmra.mxu2 %vm272_vm0, %v313_v10  ;;  %s701_s21 = scalar_lea.hbm %s700_s29, 8  ;;  %p706_p10 = scmp.lt.s32.totalorder %s700_s29, %s954_s3 }
  0x2f   : > { %537 = vmatmul.msk.bf16.vlgmr.msra.gmra.mxu3 %vm272_vm0, %v342_v11  ;;  %p702_p1 = scmp.ne.s32.totalorder %s700_s29, %s701_s21  ;;  %p707_p12 = scmp.lt.s32.totalorder %s705_s9, %s701_s21 }
  0x31   : > { %p703_p4 = pnand %p702_p1, %p877_p5  ;;  %p708_p13 = por %p707_p12, %p706_p10 }
  0x33   : > { %p704_p8 = pneg %p703_p4 }
  0x35   : > { %p709_p0 = pnand %p708_p13, %p704_p8 }
  0xaa   : > { %v285_v12 = vpop.f32.mrf.mxu0 }
  0xab   : > { %v307_v13 = vpop.f32.mrf.mxu1 }
  0xac   : > { %v308_v14 = vadd.f32 %v307_v13, %v285_v12 }
  0xb1   : > { %v335_v15 = vpop.f32.mrf.mxu2 }
  0xb2   : > { %v364_v16 = vpop.f32.mrf.mxu3  ;;  %v339_v17 = vadd.f32 %v335_v15, %v308_v14  ;;  %v287_v19 = vpop.f32.mrf.mxu0 }
  0xb3   : > { %v309_v20 = vpop.f32.mrf.mxu1 }
  0xb4   : > { %v368_v21 = vadd.f32 %v364_v16, %v339_v17 }
  0xb6   : > { %v373_v22 = vadd.f32 %v624_v18, %v368_v21 }
  0xb8   : > { %374 = vst [vmem:[%s251_s25] sm:$0xff] %v373_v22 }
  0xb9   : > { %v337_v23 = vpop.f32.mrf.mxu2 }
  0xba   : > { %v366_v24 = vpop.f32.mrf.mxu3 }
  0xbb   : > { %712 = shalt.err (!%p709_p0)
}
  0xbc   : > { %553 = dma.vmem_to_hbm [thread:$0]  (%p877_p5), %s391_s26, 128, %s393_s28, %s376_s15  }
  0xbd PF: > { %s404_s6 = sand.u32 1, %s751_s12   ;;  %p564_p3 = pnand %p507_p11, %p847_p6 }
  0xbe   : > { %s405_s1 = scalar_lea.sflag [#allocation4], %s404_s6 }
  0xbf   : > { %p565_p7 = pneg %p564_p3 }
  0xc1   : > { %746 = dma.done.wait (%p565_p7), %s405_s1, 128  }
  0xc2   : > { %748 = vsyncadd (%p565_p7), %s405_s1, 4294967168  ;;  %s20_s17 = sadd.s32 1, %s771_s17   ;;  %s964_s12 = smov %s755_s13 }
  0xc3   : > { %p17_p9 = scmp.ge.s32.totalorder %s20_s17, 4   ;;  %s965_s13 = smov %s759_s14 }
  0xc4   : > { %s966_s14 = smov %s886_s18  ;;  %s967_s15 = smov %s767_s16 }
  0xc5   : > { %s968_s16 = smov %s970_s5  ;;  %19 = sbr.rel (!%p17_p9) target bundleno = 9 (0x9), region = 91 }
  0xca   :  { %411 = vsyncpa [#allocation3], 1 }
  0xcb   :  { %413 = vsyncpa [#allocation3 + $0x1], 1 }
  0xcc   :  { %414 = vsyncpa [#allocation6], 1 }
  0xcd   :  { %415 = vsyncpa [#allocation4], 1 }
  0xce   :  { %417 = vsyncpa [#allocation4 + $0x1], 1 }

</bundles_post_ra>
